<compile_context>
chip_gen: v7x
topology: tpu7x:2x2x1
jax: 0.10.0
libtpu: 0.0.40
codegen_flags: <defaults>
</compile_context>

<pallas_src>
import math

import jax
import jax.numpy as jnp
from jax.experimental import pallas as pl
from jax.experimental.pallas import tpu as pltpu


def _torgb_kernel(wmod_ref, bias_ref, x_ref, o_ref):
    """One (spatial-tile, batch) step: out = w_mod @ x_tile + bias.

    wmod_ref : (C_out, C_in)  per-sample modulated 1x1 conv weight (x.dtype)
    bias_ref : (C_out, 1)     output bias (f32)
    x_ref    : (C_in, tn)     activation tile (native dtype)
    o_ref    : (C_out, tn)    output tile (native dtype)
    """
    acc = jnp.dot(wmod_ref[...], x_ref[...], preferred_element_type=jnp.float32)
    o_ref[...] = (acc + bias_ref[...]).astype(o_ref.dtype)


def _round_up(v, m):
    return (v + m - 1) // m * m


def _vmem_limit_bytes():
    """Scoped-VMEM limit to request: half of physical VMEM (>= 16 MiB)."""
    try:
        cap = pltpu.get_tpu_info().vmem_capacity_bytes
    except Exception:
        cap = 64 * 1024 * 1024  # conservative: v7x physical VMEM per TensorCore
    return max(16 * 1024 * 1024, cap // 2)


def _pick_spatial_tile(HW, Ci, Co, x_bytes, out_bytes, tile_budget_bytes):
    """Largest multiple-of-128 lane tile whose double-buffered tiles fit the budget."""
    LANE = 128
    hw_pad = _round_up(HW, LANE)
    ci_pad = _round_up(max(Ci, 1), 8)
    co_pad = _round_up(max(Co, 1), 8)
    # bytes per lane column: double-buffered x tile + double-buffered out tile
    per_tn = 2 * ci_pad * x_bytes + 2 * co_pad * out_bytes
    cap = max(LANE, (tile_budget_bytes // per_tn) // LANE * LANE)
    cap = min(cap, hw_pad, 32768)
    # Prefer a tile that divides H*W exactly (no masked tail) if one exists within 2x.
    if HW % LANE == 0 and HW % cap != 0:
        t = cap
        lo = max(LANE, cap // 2)
        while t >= lo:
            if HW % t == 0:
                return t
            t -= LANE
    return cap


def torgb_forward(params, x, w_latent):
    """ToRGB forward. x: (B, C_in, H, W) NCHW, w_latent: (B, w_dim) -> (B, C_out, H, W)."""
    B, Ci, H, W = x.shape
    Bw, Wd = w_latent.shape
    assert B == Bw
    conv_w = params["conv_w"]
    Co, Ci2, kh, kw = conv_w.shape
    assert Ci2 == Ci
    # TODO(synk): only kernel_size == 1 (ToRGB's default) is implemented; k > 1 would need an im2col path.
    assert kh == 1 and kw == 1

    HW = H * W
    out_dtype = x.dtype
    x_bytes = jnp.dtype(x.dtype).itemsize
    out_bytes = jnp.dtype(out_dtype).itemsize

    # ---- per-sample style + weight modulation: tiny, done once in XLA (hoisted) ----
    wf = math.sqrt(2.0 / Wd)                  # EqualizedLinear weight factor (lr_mul = 1)
    c = 1.0 / math.sqrt(Ci * kh * kw)         # ToRGB.c
    aw = params["affine_w"].astype(jnp.float32) * wf                 # (Ci, Wd)
    ab = params["affine_b"].astype(jnp.float32)                      # (Ci,)
    style = (w_latent.astype(jnp.float32) @ aw.T + ab) * c           # (B, Ci)
    cw = conv_w.reshape(Co, Ci).astype(jnp.float32)                  # (Co, Ci)
    w_mod = (cw[None, :, :] * style[:, None, :]).astype(x.dtype)     # (B, Co, Ci), tiny
    bias = params["bias"].astype(jnp.float32).reshape(Co, 1)         # (Co, 1)

    # Activations stay in native dtype / native NCHW layout, flattened to (B, Ci, H*W):
    # output lane dim is H*W -> lane-dense, unmasked vector stores.
    x2 = x.reshape(B, Ci, HW)

    vmem_limit = _vmem_limit_bytes()
    tn = _pick_spatial_tile(HW, Ci, Co, x_bytes, out_bytes, vmem_limit - (4 << 20))
    nt = pl.cdiv(HW, tn)  # partial last tile (if any) is masked by Pallas

    cost = pl.CostEstimate(
        flops=2 * B * Co * Ci * HW,
        transcendentals=0,
        bytes_accessed=(x_bytes * B * Ci * HW + out_bytes * B * Co * HW
                        + x_bytes * B * Co * Ci + 4 * Co),
    )

    out = pl.pallas_call(
        _torgb_kernel,
        out_shape=jax.ShapeDtypeStruct((B, Co, HW), out_dtype),
        grid=(nt, B),  # larger (spatial) axis leads -> even megacore split on v7x
        in_specs=[
            pl.BlockSpec((None, Co, Ci), lambda t, b: (b, 0, 0)),   # w_mod (B, Co, Ci)
            pl.BlockSpec((Co, 1), lambda t, b: (0, 0)),             # bias  (Co, 1)
            pl.BlockSpec((None, Ci, tn), lambda t, b: (b, 0, t)),   # x     (B, Ci, HW)
        ],
        out_specs=pl.BlockSpec((None, Co, tn), lambda t, b: (b, 0, t)),
        compiler_params=pltpu.CompilerParams(
            dimension_semantics=("parallel", "parallel"),
            vmem_limit_bytes=int(vmem_limit)),
        cost_estimate=cost,
    )(w_mod, bias, x2)
    return out.reshape(B, Co, H, W)


def torgb_reference(params, x, w_latent):
    """Pure-JAX reference mirroring the PyTorch ToRGB forward (f32)."""
    B, Ci, H, W = x.shape
    Wd = w_latent.shape[1]
    Co = params["conv_w"].shape[0]
    wf = math.sqrt(2.0 / Wd)
    style = w_latent.astype(jnp.float32) @ (params["affine_w"] * wf).T + params["affine_b"]
    style = style * (1.0 / math.sqrt(Ci))                                 # * ToRGB.c  (k=1)
    w = params["conv_w"].reshape(Co, Ci)
    xs = x.astype(jnp.float32) * style[:, :, None, None]                  # modulate (demod=False)
    out = jnp.einsum("oc,bchw->bohw", w, xs)                              # 1x1 grouped conv
    return out + params["bias"][None, :, None, None]


if __name__ == "__main__":
    key = jax.random.PRNGKey(0)
    k1, k2, k3, k4, k5 = jax.random.split(key, 5)

    # small shapes consistent with the module: 1x1 ToRGB, NCHW input + latent vector
    B, Ci, Co, Wd, H, W = 2, 64, 3, 32, 16, 16
    params = {
        "affine_w": jax.random.normal(k1, (Ci, Wd), jnp.float32),   # EqualizedLinear.weight (out=Ci, in=Wd)
        "affine_b": jnp.ones((Ci,), jnp.float32),                   # bias_value = 1.0
        "conv_w": jax.random.normal(k2, (Co, Ci, 1, 1), jnp.float32),
        "bias": 0.1 * jax.random.normal(k5, (Co,), jnp.float32),    # exercise the bias path
    }
    x = jax.random.normal(k3, (B, Ci, H, W), jnp.float32)
    wl = jax.random.normal(k4, (B, Wd), jnp.float32)

    fwd = jax.jit(torgb_forward)
    ref = torgb_reference(params, x, wl)

    # f32 path: strict numeric check against the PyTorch-equivalent reference.
    out = jax.block_until_ready(fwd(params, x, wl))
    assert out.shape == (B, Co, H, W), out.shape
    assert out.dtype == jnp.float32, out.dtype
    assert bool(jnp.all(jnp.isfinite(out)))
    err = float(jnp.max(jnp.abs(out.astype(jnp.float32) - ref)))
    assert err < 1e-3, f"f32 max abs err {err}"

    # bf16 path (native-dtype contract from the perf review): loose numeric check.
    out_bf16 = jax.block_until_ready(fwd(params, x.astype(jnp.bfloat16), wl))
    assert out_bf16.shape == (B, Co, H, W)
    assert out_bf16.dtype == jnp.bfloat16, out_bf16.dtype
    assert bool(jnp.all(jnp.isfinite(out_bf16.astype(jnp.float32))))
    err_bf16 = float(jnp.max(jnp.abs(out_bf16.astype(jnp.float32) - ref)))
    assert err_bf16 < 0.25, f"bf16 max abs err {err_bf16}"

    print("KERNEL_OK")
</pallas_src>

<mosaic_0001>
module attributes {stable_mosaic.version = 11 : i64} {
  func.func @_torgb_kernel(%arg0: i32, %arg1: i32, %arg2: memref<1x3x64xf32, #tpu.memory_space<vmem>>, %arg3: memref<3x1xf32, #tpu.memory_space<vmem>>, %arg4: memref<1x64x256xf32, #tpu.memory_space<vmem>>, %arg5: memref<1x3x256xf32, #tpu.memory_space<vmem>>) attributes {dimension_semantics = [#tpu.dimension_semantics<parallel>, #tpu.dimension_semantics<parallel>], iteration_bounds = array<i64: 1, 2>, scalar_prefetch = 0 : i64, scratch_operands = 0 : i64, tpu.core_type = #tpu.core_type<tc>, window_params = [{transform_indices = @transform_0, window_bounds = array<i64: 1, 3, 64>}, {pipeline_mode = #tpu.pipeline_mode<synchronous>, transform_indices = @transform_1, window_bounds = array<i64: 3, 1>}, {transform_indices = @transform_2, window_bounds = array<i64: 1, 64, 256>}, {transform_indices = @transform_3, window_bounds = array<i64: 1, 3, 256>}]} {
    %c0 = arith.constant 0 : index
    %c0_0 = arith.constant 0 : index
    %c0_1 = arith.constant 0 : index
    %0 = vector.load %arg2[%c0, %c0_0, %c0_1] : memref<1x3x64xf32, #tpu.memory_space<vmem>>, vector<1x3x64xf32>
    %1 = vector.shape_cast %0 : vector<1x3x64xf32> to vector<3x64xf32>
    %c0_2 = arith.constant 0 : index
    %c0_3 = arith.constant 0 : index
    %c0_4 = arith.constant 0 : index
    %2 = vector.load %arg4[%c0_2, %c0_3, %c0_4] : memref<1x64x256xf32, #tpu.memory_space<vmem>>, vector<1x64x256xf32>
    %3 = vector.shape_cast %2 : vector<1x64x256xf32> to vector<64x256xf32>
    %cst = arith.constant dense<0.000000e+00> : vector<3x256xf32>
    %4 = tpu.matmul %1, %3, %cst {dimension_numbers = #tpu.dot_dimension_numbers<[1], [0], [0], [1], [0, 0, 1, 1], [], []>} : vector<3x64xf32>, vector<64x256xf32>, vector<3x256xf32> -> vector<3x256xf32>
    %c0_5 = arith.constant 0 : index
    %c0_6 = arith.constant 0 : index
    %5 = vector.load %arg3[%c0_5, %c0_6] : memref<3x1xf32, #tpu.memory_space<vmem>>, vector<3x1xf32>
    %6 = vector.broadcast %5 : vector<3x1xf32> to vector<3x256xf32>
    %7 = arith.addf %4, %6 : vector<3x256xf32>
    %c0_7 = arith.constant 0 : index
    %c0_8 = arith.constant 0 : index
    %c0_9 = arith.constant 0 : index
    %8 = vector.load %arg5[%c0_7, %c0_8, %c0_9] : memref<1x3x256xf32, #tpu.memory_space<vmem>>, vector<1x3x256xf32>
    %9 = vector.shape_cast %8 : vector<1x3x256xf32> to vector<3x256xf32>
    %10 = vector.shape_cast %7 : vector<3x256xf32> to vector<1x3x256xf32>
    tpu.vector_store %arg5[%c0_7, %c0_8, %c0_9], %10 {strides = array<i32>} : memref<1x3x256xf32, #tpu.memory_space<vmem>>, vector<1x3x256xf32>,
    return
  }
  func.func @transform_0(%arg0: i32, %arg1: i32) -> (i32, i32, i32) {
    %c0_i32 = arith.constant 0 : i32
    %c0_i32_0 = arith.constant 0 : i32
    %c0_i32_1 = arith.constant 0 : i32
    return %arg1, %c0_i32, %c0_i32_0 : i32, i32, i32
  }
  func.func @transform_1(%arg0: i32, %arg1: i32) -> (i32, i32) {
    %c0_i32 = arith.constant 0 : i32
    %c0_i32_0 = arith.constant 0 : i32
    %c0_i32_1 = arith.constant 0 : i32
    return %c0_i32, %c0_i32_0 : i32, i32
  }
  func.func @transform_2(%arg0: i32, %arg1: i32) -> (i32, i32, i32) {
    %c0_i32 = arith.constant 0 : i32
    %c0_i32_0 = arith.constant 0 : i32
    return %arg1, %c0_i32, %arg0 : i32, i32, i32
  }
  func.func @transform_3(%arg0: i32, %arg1: i32) -> (i32, i32, i32) {
    %c0_i32 = arith.constant 0 : i32
    %c0_i32_0 = arith.constant 0 : i32
    return %arg1, %c0_i32, %arg0 : i32, i32, i32
  }
}

</mosaic_0001>

<bundles_post_ra>
// kernel: torgb_forward.1
= control target key start
LH: loop header
LB: loop body
LE: loop exit
PB: predicated region body
PF: predicated region fallthrough
CT: control target
= control target key end

     0   :  { %s533_s12 = smov 0   ;;  %s535_s13 = smov 0   ;;  %s577_s0 = inlined_call_operand.vmem [shape: f32[2,3,64], index: 0, kind: input, shape index: {}]   ;;  %s578_s1 = inlined_call_operand.vmem [shape: f32[3,1], index: 1, kind: input, shape index: {}]   ;;  %s579_s2 = inlined_call_operand.vmem [shape: f32[2,64,256], index: 2, kind: input, shape index: {}]   ;;  %s580_s3 = inlined_call_operand.vmem [shape: f32[2,3,256], index: 3, kind: output, shape index: {}]  }
   0x1   :  { %s537_s14 = smov 0  }
   0x2 LB: > { %s22_s15 = sadd.s32 1, %s505_s13  ;;  %p433_p0 = scmp.ge.s32.totalorder %s509_s14, 1  ;;  %s509_s14 = sphi %s537_s14, %s13_s14   ;;  %s505_s13 = sphi %s535_s13, %s582_s13   ;;  %s501_s12 = sphi %s533_s12, %s581_s12  }
   0x3   : > { %p23_p1 = scmp.ge.s32.totalorder %s22_s15, 2  ;;  %p167_p2 = scmp.lt.s32.totalorder %s509_s14, 3 }
   0x5   : > { %s584_s15 = smov (%p23_p1, %s22_s15), 0  ;;  %p168_p3 = pnand %p433_p0, %p167_p2 }
   0x6   : > { %p203_p4 = scmp.lt.s32.totalorder (!%p168_p3), %s501_s12, 1  ;;  %v244_v0 = vld [vmem:[%s578_s1] sm:$0x7] (!%p168_p3)  ;;  %v511_v1 = vmov (!%p168_p3), 0.0   ;;  %v512_v2 = vmov (!%p168_p3), 0   ;;  %vm250_vm0 = vcmask (!%p168_p3), 523264  }
   0x7   : > { %171 = sbr.rel (%p168_p3) target bundleno = 254 (0xfe), region = 32  ;;  %318 = vmatprep.mubr.f32.mxu0 (!%p168_p3), %v511_v1  ;;  %486 = vset.pattern.permute.xlu0 (!%p168_p3), %v512_v2 }
   0x8   : > { %247 = vperm.xlu0 (!%p168_p3), %486, %v244_v0  }
   0xe   : > { %s586_s12 = smov (!%p203_p4, %s501_s12), 1 }
   0xf   : > { %s442_s18 = sshll.u32 %s586_s12, 7  ;;  %s434_s22 = sshll.u32 %s586_s12, 2 }
  0x10   : > { %s215_s21 = scalar_lea.vmem %s579_s2, %s442_s18  ;;  %s206_s25 = scalar_lea.vmem %s577_s0, %s434_s22 }
  0x11   : > { %v229_v3 = vld [vmem:[%s215_s21 + $0x8] sm:$0xff]  ;;  %v231_v4 = vld [vmem:[%s215_s21 + $0x18] sm:$0xff]  ;;  %v228_v5 = vld [vmem:[%s215_s21] sm:$0xff]  ;;  %s443_s26 = sshll.u32 %s586_s12, 3 }
  0x12   : > { %v444_v6 = vpack.c.bf16 %v231_v4, %v229_v3  ;;  %v230_v7 = vld [vmem:[%s215_s21 + $0x10] sm:$0xff]  ;;  %v233_v8 = vld [vmem:[%s215_s21 + $0x28] sm:$0xff]  ;;  %v235_v9 = vld [vmem:[%s215_s21 + $0x38] sm:$0xff]  ;;  %s225_s29 = scalar_lea.vmem %s580_s3, %s443_s26 }
  0x13   : > { %v446_v10 = vpack.c.bf16 %v230_v7, %v228_v5  ;;  %v448_v11 = vpack.c.bf16 %v235_v9, %v233_v8  ;;  %v232_v12 = vld [vmem:[%s215_s21 + $0x20] sm:$0xff]  ;;  %v234_v13 = vld [vmem:[%s215_s21 + $0x30] sm:$0xff]  ;;  %v237_v14 = vld [vmem:[%s215_s21 + $0x48] sm:$0xff] }
  0x14   : > { %445 = vmatprep.subr.bf16.mxu0 %v444_v6  ;;  %v239_v15 = vld [vmem:[%s215_s21 + $0x58] sm:$0xff]  ;;  %v450_v16 = vpack.c.bf16 %v234_v13, %v232_v12  ;;  %v236_v18 = vld [vmem:[%s215_s21 + $0x40] sm:$0xff]  ;;  %v238_v19 = vld [vmem:[%s215_s21 + $0x50] sm:$0xff] }
  0x15   : > { %447 = vmatpush1.bf16.msra.mxu0 %v446_v10  ;;  %v452_v17 = vpack.c.bf16 %v239_v15, %v237_v14  ;;  %v241_v20 = vld [vmem:[%s215_s21 + $0x68] sm:$0xff]  ;;  %v243_v21 = vld [vmem:[%s215_s21 + $0x78] sm:$0xff]  ;;  %v454_v22 = vpack.c.bf16 %v238_v19, %v236_v18  ;;  %v240_v24 = vld [vmem:[%s215_s21 + $0x60] sm:$0xff] }
  0x16   : > { %449 = vmatprep.subr.bf16.mxu0 %v448_v11  ;;  %v456_v23 = vpack.c.bf16 %v243_v21, %v241_v20  ;;  %v242_v25 = vld [vmem:[%s215_s21 + $0x70] sm:$0xff]  ;;  %v227_v27 = vld [vmem:[%s206_s25] sm:$0x7] }
  0x17   : > { %v458_v26 = vpack.c.bf16 %v242_v25, %v240_v24 }
  0x19   : > { %451 = vmatpush1.bf16.msra.mxu0 %v450_v16 }
  0x1a   : > { %453 = vmatprep.subr.bf16.mxu0 %v452_v17 }
  0x1d   : > { %455 = vmatpush1.bf16.msra.mxu0 %v454_v22 }
  0x1e   : > { %457 = vmatprep.subr.bf16.mxu0 %v456_v23 }
  0x21   : > { %459 = vmatpush1.bf16.msra.mxu0 %v458_v26 }
  0x24   : > { %439 = vmatmul.mubr.msk.f32.vlgmr.msra.gmra.mrb[0].mxu0 %vm250_vm0, %v227_v27 }
  0x87   : > { %v248_v28 = vpop.permute.xlu0 %247 }
  0xf7   : > { %v320_v29 = vpop.f32.mrb[0].mxu0 }
  0xf8   : > { %v321_v30 = vadd.f32 %v320_v29, %v248_v28  ;;  %v322_v31 = vpop.f32.mrb[1].mxu0 }
  0xf9   : > { %v323_v32 = vadd.f32 %v322_v31, %v248_v28 }
  0xfb   : > { %v327_v33 = vcombine.low %v321_v30, %v323_v32 }
  0xfd   : > { %329 = vst [vmem:[%s225_s29] sm:$0x77] %v327_v33 }
  0xfe PF: > { %s13_s14 = sadd.s32 1, %s509_s14   ;;  %s581_s12 = smov %s505_s13 }
  0xff   : > { %p10_p5 = scmp.ge.s32.totalorder %s13_s14, 4   ;;  %s582_s13 = smov %s584_s15 }
 0x101   :  { %12 = sbr.rel (!%p10_p5) target bundleno = 2 (0x2), region = 65 }

</bundles_post_ra>
